<compile_context>
chip_gen: v7x
topology: tpu7x:2x2x1
jax: 0.10.0
libtpu: 0.0.40
codegen_flags: <defaults>
</compile_context>

<pallas_src>
from functools import partial

import jax
import jax.numpy as jnp
from jax.experimental import pallas as pl
from jax.experimental.pallas import tpu as pltpu


# ---------------------------------------------------------------------------
# Pallas kernel: per batch-block fused tempered-KL (kd_loss) + cross-entropy.
# ---------------------------------------------------------------------------
def _kd_ce_kernel(s_ref, t_ref, y_ref, kl_ref, ce_ref, *, temperature, num_valid):
    i = pl.program_id(0)
    bn, c = s_ref.shape

    s_raw = s_ref[...].astype(jnp.float32)          # (bn, C) student logits
    t_raw = t_ref[...].astype(jnp.float32)          # (bn, C) teacher logits
    y = y_ref[...]                                  # (bn, 1) int32 labels

    # Mask rows past the true batch size (last, partial block reads padding).
    row_ids = i * bn + jax.lax.broadcasted_iota(jnp.int32, (bn, 1), 0)
    valid = row_ids < num_valid                     # (bn, 1) bool
    validf = valid.astype(jnp.float32)
    s_raw = jnp.where(valid, s_raw, 0.0)            # keep padded rows finite
    t_raw = jnp.where(valid, t_raw, 0.0)

    inv_t = jnp.float32(1.0 / temperature)
    s = s_raw * inv_t
    t = t_raw * inv_t

    # Student tempered log-softmax.
    s_shift = s - jnp.max(s, axis=-1, keepdims=True)
    s_lse = jnp.log(jnp.sum(jnp.exp(s_shift), axis=-1, keepdims=True))
    log_ps = s_shift - s_lse

    # Teacher tempered softmax / log-softmax.
    t_shift = t - jnp.max(t, axis=-1, keepdims=True)
    t_exp = jnp.exp(t_shift)
    t_sum = jnp.sum(t_exp, axis=-1, keepdims=True)
    p_t = t_exp / t_sum
    log_pt = t_shift - jnp.log(t_sum)

    # Per-row KL(p_t || p_s) = sum_j p_t * (log p_t - log p_s).
    kl_row = jnp.sum(p_t * (log_pt - log_ps), axis=-1, keepdims=True)      # (bn,1)

    # Cross-entropy of the *raw* (un-tempered) student logits vs. labels.
    r_max = jnp.max(s_raw, axis=-1, keepdims=True)
    r_lse = jnp.log(jnp.sum(jnp.exp(s_raw - r_max), axis=-1, keepdims=True)) + r_max
    class_ids = jax.lax.broadcasted_iota(jnp.int32, (bn, c), 1)
    onehot = (class_ids == y).astype(jnp.float32)                           # (bn,C)
    s_y = jnp.sum(onehot * s_raw, axis=-1, keepdims=True)
    ce_row = r_lse - s_y                                                    # (bn,1)

    kl_ref[...] = jnp.sum(kl_row * validf, axis=0, keepdims=True)           # (1,1)
    ce_ref[...] = jnp.sum(ce_row * validf, axis=0, keepdims=True)           # (1,1)


# ---------------------------------------------------------------------------
# Wrapper: tiling + final (tiny) reduction and loss weighting.
# ---------------------------------------------------------------------------
def kd_and_gt_losses(logits_student, logits_teacher, labels, *, temperature=1.0,
                     gt_loss_weight=1.0, kd_loss_weight=1.0, block_rows=128):
    n, c = logits_student.shape
    bn = n if n <= block_rows else block_rows
    if bn != n and bn % 8 != 0:                      # (8,128) sublane rule
        bn = 8 * ((bn + 7) // 8)
    g = pl.cdiv(n, bn)
    labels2 = labels.astype(jnp.int32).reshape(n, 1)

    kernel = partial(_kd_ce_kernel, temperature=float(temperature), num_valid=n)
    kl_parts, ce_parts = pl.pallas_call(
        kernel,
        out_shape=(jax.ShapeDtypeStruct((g, 1), jnp.float32),
                   jax.ShapeDtypeStruct((g, 1), jnp.float32)),
        grid=(g,),
        in_specs=[
            pl.BlockSpec((bn, c), lambda i: (i, 0)),   # student logits (lane-dense)
            pl.BlockSpec((bn, c), lambda i: (i, 0)),   # teacher logits (lane-dense)
            pl.BlockSpec((bn, 1), lambda i: (i, 0)),   # labels
        ],
        out_specs=(
            pl.BlockSpec((1, 1), lambda i: (i, 0)),    # per-block KL partial
            pl.BlockSpec((1, 1), lambda i: (i, 0)),    # per-block CE partial
        ),
        compiler_params=pltpu.CompilerParams(dimension_semantics=("parallel",)),
    )(logits_student, logits_teacher, labels2)

    loss_kd = kd_loss_weight * (jnp.sum(kl_parts) / n) * (temperature ** 2)
    loss_gt = gt_loss_weight * (jnp.sum(ce_parts) / n)
    return loss_gt, loss_kd


# ---------------------------------------------------------------------------
# Forward-only JAX port of the PyTorch KD distiller.
# ---------------------------------------------------------------------------
class KD:
    def __init__(self, student_params, teacher_params, *, gt_loss_weight=1.0,
                 kd_loss_weight=1.0, kd_temperature=4.0):
        self.ws, self.bs = student_params
        self.wt, self.bt = teacher_params
        self.gt_loss_weight = gt_loss_weight
        self.kd_loss_weight = kd_loss_weight
        self.kd_temperature = kd_temperature

    def __call__(self, image, label):
        feats = image.reshape(image.shape[0], -1)
        logits_teacher = jax.lax.stop_gradient(feats @ self.wt + self.bt)  # teacher.eval(), no grad
        logits_student = feats @ self.ws + self.bs
        loss_gt, loss_kd = kd_and_gt_losses(
            logits_student, logits_teacher, label,
            temperature=self.kd_temperature,
            gt_loss_weight=self.gt_loss_weight,
            kd_loss_weight=self.kd_loss_weight)
        return logits_student, {"loss_gt": loss_gt, "loss_kd": loss_kd}


# ---------------------------------------------------------------------------
# Pure-JAX references (mirror F.kl_div('batchmean') and F.cross_entropy).
# ---------------------------------------------------------------------------
def _kd_loss_ref(ls, lt, temperature):
    log_ps = jax.nn.log_softmax(ls / temperature, axis=1)
    p_t = jax.nn.softmax(lt / temperature, axis=1)
    log_pt = jax.nn.log_softmax(lt / temperature, axis=1)
    kl = jnp.sum(p_t * (log_pt - log_ps)) / ls.shape[0]
    return kl * temperature ** 2


def _ce_ref(ls, y):
    logp = jax.nn.log_softmax(ls, axis=1)
    return -jnp.mean(jnp.take_along_axis(logp, y[:, None], axis=1))


if __name__ == "__main__":
    key = jax.random.PRNGKey(0)
    k1, k2, k3, k4, k5 = jax.random.split(key, 5)

    batch, chans, hw, num_classes = 8, 3, 8, 32
    feat_dim = chans * hw * hw

    image = jax.random.normal(k1, (batch, chans, hw, hw), dtype=jnp.float32)
    label = jax.random.randint(k2, (batch,), 0, num_classes)

    ws = 0.05 * jax.random.normal(k3, (feat_dim, num_classes), jnp.float32)
    bs = jnp.zeros((num_classes,), jnp.float32)
    wt = 0.05 * jax.random.normal(k4, (feat_dim, num_classes), jnp.float32)
    bt = 0.05 * jax.random.normal(k5, (num_classes,), jnp.float32)

    gt_w, kd_w, temp = 1.0, 1.0, 4.0
    distiller = KD((ws, bs), (wt, bt), gt_loss_weight=gt_w,
                   kd_loss_weight=kd_w, kd_temperature=temp)

    logits_student, losses = distiller(image, label)
    logits_student = jax.block_until_ready(logits_student)
    losses = jax.block_until_ready(losses)

    # Reference check.
    feats = image.reshape(batch, -1)
    ls_ref = feats @ ws + bs
    lt_ref = feats @ wt + bt
    ref_gt = gt_w * _ce_ref(ls_ref, label)
    ref_kd = kd_w * _kd_loss_ref(ls_ref, lt_ref, temp)

    assert logits_student.shape == (batch, num_classes)
    assert jnp.allclose(losses["loss_gt"], ref_gt, rtol=1e-5, atol=1e-5), "loss_gt mismatch"
    assert jnp.allclose(losses["loss_kd"], ref_kd, rtol=1e-5, atol=1e-5), "loss_kd mismatch"
    print("KERNEL_OK")
</pallas_src>

<mosaic_0001>
module attributes {stable_mosaic.version = 11 : i64} {
  func.func @_kd_ce_kernel(%arg0: i32, %arg1: memref<8x32xf32, #tpu.memory_space<vmem>>, %arg2: memref<8x32xf32, #tpu.memory_space<vmem>>, %arg3: memref<8x1xi32, #tpu.memory_space<vmem>>, %arg4: memref<1x1xf32, #tpu.memory_space<vmem>>, %arg5: memref<1x1xf32, #tpu.memory_space<vmem>>) attributes {dimension_semantics = [#tpu.dimension_semantics<parallel>], iteration_bounds = array<i64: 1>, scalar_prefetch = 0 : i64, scratch_operands = 0 : i64, tpu.core_type = #tpu.core_type<tc>, window_params = [{transform_indices = @transform_0, window_bounds = array<i64: 8, 32>}, {transform_indices = @transform_1, window_bounds = array<i64: 8, 32>}, {transform_indices = @transform_2, window_bounds = array<i64: 8, 1>}, {transform_indices = @transform_3, window_bounds = array<i64: 1, 1>}, {transform_indices = @transform_4, window_bounds = array<i64: 1, 1>}]} {
    %c0 = arith.constant 0 : index
    %c0_0 = arith.constant 0 : index
    %0 = vector.load %arg1[%c0, %c0_0] : memref<8x32xf32, #tpu.memory_space<vmem>>, vector<8x32xf32>
    %c0_1 = arith.constant 0 : index
    %c0_2 = arith.constant 0 : index
    %1 = vector.load %arg2[%c0_1, %c0_2] : memref<8x32xf32, #tpu.memory_space<vmem>>, vector<8x32xf32>
    %c0_3 = arith.constant 0 : index
    %c0_4 = arith.constant 0 : index
    %2 = vector.load %arg3[%c0_3, %c0_4] : memref<8x1xi32, #tpu.memory_space<vmem>>, vector<8x1xi32>
    %c8_i32 = arith.constant 8 : i32
    %3 = arith.muli %arg0, %c8_i32 : i32
    %4 = tpu.iota {dimensions = array<i32: 0>} : vector<8x1xi32>
    %5 = vector.broadcast %3 : i32 to vector<8x1xi32>
    %6 = arith.addi %5, %4 : vector<8x1xi32>
    %c8_i32_5 = arith.constant 8 : i32
    %7 = vector.broadcast %c8_i32_5 : i32 to vector<8x1xi32>
    %8 = arith.cmpi slt, %6, %7 : vector<8x1xi32>
    %9 = arith.extui %8 : vector<8x1xi1> to vector<8x1xi32>
    %10 = arith.sitofp %9 : vector<8x1xi32> to vector<8x1xf32>
    %cst = arith.constant 0.000000e+00 : f32
    %11 = vector.shape_cast %8 : vector<8x1xi1> to vector<8x1xi1>
    %12 = vector.broadcast %11 : vector<8x1xi1> to vector<8x32xi1>
    %13 = vector.broadcast %cst : f32 to vector<8x32xf32>
    %14 = arith.select %12, %0, %13 : vector<8x32xi1>, vector<8x32xf32>
    %cst_6 = arith.constant 0.000000e+00 : f32
    %15 = vector.shape_cast %8 : vector<8x1xi1> to vector<8x1xi1>
    %16 = vector.broadcast %15 : vector<8x1xi1> to vector<8x32xi1>
    %17 = vector.broadcast %cst_6 : f32 to vector<8x32xf32>
    %18 = arith.select %16, %1, %17 : vector<8x32xi1>, vector<8x32xf32>
    %cst_7 = arith.constant 2.500000e-01 : f32
    %19 = vector.broadcast %cst_7 : f32 to vector<8x32xf32>
    %20 = arith.mulf %14, %19 : vector<8x32xf32>
    %cst_8 = arith.constant 2.500000e-01 : f32
    %21 = vector.broadcast %cst_8 : f32 to vector<8x32xf32>
    %22 = arith.mulf %18, %21 : vector<8x32xf32>
    %cst_9 = arith.constant dense<0xFF800000> : vector<8xf32>
    %23 = vector.multi_reduction <maximumf>, %20, %cst_9 [1] : vector<8x32xf32> to vector<8xf32>
    %24 = vector.shape_cast %23 : vector<8xf32> to vector<8x1xf32>
    %25 = vector.broadcast %24 : vector<8x1xf32> to vector<8x32xf32>
    %26 = arith.subf %20, %25 : vector<8x32xf32>
    %27 = math.exp %26 : vector<8x32xf32>
    %cst_10 = arith.constant dense<0.000000e+00> : vector<8xf32>
    %28 = vector.multi_reduction <add>, %27, %cst_10 [1] : vector<8x32xf32> to vector<8xf32>
    %29 = vector.shape_cast %28 : vector<8xf32> to vector<8x1xf32>
    %30 = math.log %29 : vector<8x1xf32>
    %31 = vector.broadcast %30 : vector<8x1xf32> to vector<8x32xf32>
    %32 = arith.subf %26, %31 : vector<8x32xf32>
    %cst_11 = arith.constant dense<0xFF800000> : vector<8xf32>
    %33 = vector.multi_reduction <maximumf>, %22, %cst_11 [1] : vector<8x32xf32> to vector<8xf32>
    %34 = vector.shape_cast %33 : vector<8xf32> to vector<8x1xf32>
    %35 = vector.broadcast %34 : vector<8x1xf32> to vector<8x32xf32>
    %36 = arith.subf %22, %35 : vector<8x32xf32>
    %37 = math.exp %36 : vector<8x32xf32>
    %cst_12 = arith.constant dense<0.000000e+00> : vector<8xf32>
    %38 = vector.multi_reduction <add>, %37, %cst_12 [1] : vector<8x32xf32> to vector<8xf32>
    %39 = vector.shape_cast %38 : vector<8xf32> to vector<8x1xf32>
    %40 = vector.broadcast %39 : vector<8x1xf32> to vector<8x32xf32>
    %41 = arith.divf %37, %40 : vector<8x32xf32>
    %42 = math.log %39 : vector<8x1xf32>
    %43 = vector.broadcast %42 : vector<8x1xf32> to vector<8x32xf32>
    %44 = arith.subf %36, %43 : vector<8x32xf32>
    %45 = arith.subf %44, %32 : vector<8x32xf32>
    %46 = arith.mulf %41, %45 : vector<8x32xf32>
    %cst_13 = arith.constant dense<0.000000e+00> : vector<8xf32>
    %47 = vector.multi_reduction <add>, %46, %cst_13 [1] : vector<8x32xf32> to vector<8xf32>
    %48 = vector.shape_cast %47 : vector<8xf32> to vector<8x1xf32>
    %cst_14 = arith.constant dense<0xFF800000> : vector<8xf32>
    %49 = vector.multi_reduction <maximumf>, %14, %cst_14 [1] : vector<8x32xf32> to vector<8xf32>
    %50 = vector.shape_cast %49 : vector<8xf32> to vector<8x1xf32>
    %51 = vector.broadcast %50 : vector<8x1xf32> to vector<8x32xf32>
    %52 = arith.subf %14, %51 : vector<8x32xf32>
    %53 = math.exp %52 : vector<8x32xf32>
    %cst_15 = arith.constant dense<0.000000e+00> : vector<8xf32>
    %54 = vector.multi_reduction <add>, %53, %cst_15 [1] : vector<8x32xf32> to vector<8xf32>
    %55 = vector.shape_cast %54 : vector<8xf32> to vector<8x1xf32>
    %56 = math.log %55 : vector<8x1xf32>
    %57 = arith.addf %56, %50 : vector<8x1xf32>
    %58 = tpu.iota {dimensions = array<i32: 1>} : vector<8x32xi32>
    %59 = vector.broadcast %2 : vector<8x1xi32> to vector<8x32xi32>
    %60 = arith.cmpi eq, %58, %59 : vector<8x32xi32>
    %61 = arith.extui %60 : vector<8x32xi1> to vector<8x32xi32>
    %62 = arith.sitofp %61 : vector<8x32xi32> to vector<8x32xf32>
    %63 = arith.mulf %62, %14 : vector<8x32xf32>
    %cst_16 = arith.constant dense<0.000000e+00> : vector<8xf32>
    %64 = vector.multi_reduction <add>, %63, %cst_16 [1] : vector<8x32xf32> to vector<8xf32>
    %65 = vector.shape_cast %64 : vector<8xf32> to vector<8x1xf32>
    %66 = arith.subf %57, %65 : vector<8x1xf32>
    %67 = arith.mulf %48, %10 : vector<8x1xf32>
    %cst_17 = arith.constant dense<0.000000e+00> : vector<1xf32>
    %68 = vector.multi_reduction <add>, %67, %cst_17 [0] : vector<8x1xf32> to vector<1xf32>
    %69 = vector.shape_cast %68 : vector<1xf32> to vector<1x1xf32>
    %c0_18 = arith.constant 0 : index
    %c0_19 = arith.constant 0 : index
    %70 = vector.load %arg4[%c0_18, %c0_19] : memref<1x1xf32, #tpu.memory_space<vmem>>, vector<1x1xf32>
    tpu.vector_store %arg4[%c0_18, %c0_19], %69 {strides = array<i32>} : memref<1x1xf32, #tpu.memory_space<vmem>>, vector<1x1xf32>,
    %71 = arith.mulf %66, %10 : vector<8x1xf32>
    %cst_20 = arith.constant dense<0.000000e+00> : vector<1xf32>
    %72 = vector.multi_reduction <add>, %71, %cst_20 [0] : vector<8x1xf32> to vector<1xf32>
    %73 = vector.shape_cast %72 : vector<1xf32> to vector<1x1xf32>
    %c0_21 = arith.constant 0 : index
    %c0_22 = arith.constant 0 : index
    %74 = vector.load %arg5[%c0_21, %c0_22] : memref<1x1xf32, #tpu.memory_space<vmem>>, vector<1x1xf32>
    tpu.vector_store %arg5[%c0_21, %c0_22], %73 {strides = array<i32>} : memref<1x1xf32, #tpu.memory_space<vmem>>, vector<1x1xf32>,
    return
  }
  func.func @transform_0(%arg0: i32) -> (i32, i32) {
    %c0_i32 = arith.constant 0 : i32
    %c0_i32_0 = arith.constant 0 : i32
    return %arg0, %c0_i32 : i32, i32
  }
  func.func @transform_1(%arg0: i32) -> (i32, i32) {
    %c0_i32 = arith.constant 0 : i32
    %c0_i32_0 = arith.constant 0 : i32
    return %arg0, %c0_i32 : i32, i32
  }
  func.func @transform_2(%arg0: i32) -> (i32, i32) {
    %c0_i32 = arith.constant 0 : i32
    %c0_i32_0 = arith.constant 0 : i32
    return %arg0, %c0_i32 : i32, i32
  }
  func.func @transform_3(%arg0: i32) -> (i32, i32) {
    %c0_i32 = arith.constant 0 : i32
    %c0_i32_0 = arith.constant 0 : i32
    return %arg0, %c0_i32 : i32, i32
  }
  func.func @transform_4(%arg0: i32) -> (i32, i32) {
    %c0_i32 = arith.constant 0 : i32
    %c0_i32_0 = arith.constant 0 : i32
    return %arg0, %c0_i32 : i32, i32
  }
}

</mosaic_0001>

<bundles_post_ra>
// kernel: tpu_custom_call.1
= control target key start
LH: loop header
LB: loop body
LE: loop exit
PB: predicated region body
PF: predicated region fallthrough
CT: control target
= control target key end

     0   :  { %10 = vsyncpa [#allocation3], 0  ;;  %s325_s0 = inlined_call_operand.vmem [shape: f32[8,32], index: 0, kind: input, shape index: {}]   ;;  %s326_s1 = inlined_call_operand.hbm [shape: f32[8,32], index: 1, kind: input, shape index: {}]   ;;  %s327_s2 = inlined_call_operand.vmem [shape: s32[8,1], index: 2, kind: input, shape index: {}]   ;;  %s328_s3 = inlined_call_operand.hbm [shape: f32[1,1], index: 3, kind: output, shape index: {0}]   ;;  %s329_s4 = inlined_call_operand.hbm [shape: f32[1,1], index: 4, kind: output, shape index: {1}]  }
   0x1   :  { %11 = vsyncpa [#allocation4], 0 }
   0x2   :  { %12 = vsyncpa [#allocation7], 0  ;;  %s243_s15 = smov [#allocation2]   ;;  %s171_s19 = scalar_lea.hbm %s326_s1, 128 }
   0x3   :  { %s21_s16 = sshll.u32 %s243_s15, 4  ;;  %p172_p0 = scmp.ne.s32.totalorder %s326_s1, %s171_s19  ;;  %s22_s16 = int_to_ptr.vmem [resolvable:$true] %s21_s16 }
   0x4   :  { %p175_p1 = scmp.lt.u32.totalorder %s171_s19, %s326_s1 }
   0x6   :  { %p177_p2 = pnand %p175_p1, %p172_p0 }
   0x8   :  { %180 = shalt.err (!%p177_p2)
}
   0x9   :  { %s181_s24 = scalar_lea.vmem %s22_s16, 128  ;;  %p186_p4 = scmp.lt.s32.totalorder %s22_s16, %s22_s16 }
   0xa   :  { %p182_p3 = scmp.ne.s32.totalorder %s22_s16, %s181_s24  ;;  %p187_p5 = scmp.lt.s32.totalorder %s181_s24, %s181_s24 }
   0xc   :  { %p188_p6 = por %p187_p5, %p186_p4 }
   0xe   :  { %p189_p7 = pnand %p188_p6, %p182_p3 }
  0x10   :  { %192 = shalt.err (!%p189_p7)
}
  0x11   :  { %24 = dma.hbm_to_vmem [thread:$0]  %s326_s1, 128, %s22_s16, [#allocation3]  }
  0x12   :  { %237 = dma.done.wait [#allocation3], 128  }
  0x13   :  { %238 = vsyncadd [#allocation3], 4294967168  ;;  %v30_v0 = vld [vmem:[%s325_s0] sm:$0xff]  ;;  %vm46_vm0 = vcmask 261120   ;;  %v244_v7 = vmov 0   ;;  %v90_v24 = vlaneseq  ;;  %v245_v29 = vmov 0.0  }
  0x14   :  { %v31_v1 = vld [vmem:[#allocation2] sm:$0xff]  ;;  %v44_v2 = vmul.f32 0.25, %v30_v0  ;;  %v78_v4 = vsel %vm46_vm0, %v30_v0, -inf  ;;  %155 = vset.pattern.permute.xlu1 %v244_v7  ;;  %156 = vset.pattern.permute.xlu0 %v244_v7  ;;  %vm110_vm2 = vcmask 0  }
  0x15   :  { %v45_v3 = vmul.f32 0.25, %v31_v1  ;;  %79 = vmax.xlane.f32.xlu1 %v78_v4  ;;  %v32_v23 = vld [vmem:[%s327_s2] sm:$0xff]  ;;  %v91_v26 = vand.u32 127, %v90_v24  ;;  %s246_s2 = smov [#allocation6]  }
  0x16   :  { %v47_v5 = vsel %vm46_vm0, %v44_v2, -inf  ;;  %s136_s29 = sshll.u32 %s246_s2, 4  ;;  %s137_s29 = int_to_ptr.vmem [resolvable:$true] %s136_s29 }
  0x17   :  { %48 = vmax.xlane.f32.xlu0 %v47_v5  ;;  %v59_v6 = vsel %vm46_vm0, %v45_v3, -inf  ;;  %s193_s30 = scalar_lea.vmem %s137_s29, 16  ;;  %s197_s5 = scalar_lea.vmem %s137_s29, 32 }
  0x18   :  { %p194_p8 = scmp.ne.s32.totalorder %s137_s29, %s193_s30  ;;  %p198_p9 = scmp.lt.s32.totalorder %s137_s29, %s137_s29 }
  0x19   :  { %p199_p10 = scmp.lt.s32.totalorder %s197_s5, %s193_s30 }
  0x1b   :  { %60 = vmax.xlane.f32.xlu0 %v59_v6  ;;  %p200_p11 = por %p199_p10, %p198_p9 }
  0x1d   :  { %p201_p12 = pnand %p200_p11, %p194_p8 }
  0xa2   :  { %v80_v8 = vpop.xlane.xlu1 %79 }
  0xa3   :  { %v81_v10 = vsub.f32 %v30_v0, %v80_v8 }
  0xa4   :  { %v49_v9 = vpop.xlane.xlu0 %48 }
  0xa5   :  { %v50_v11 = vsub.f32 %v44_v2, %v49_v9  ;;  %v82_v14 = vmul.f32 1.442695, %v81_v10 }
  0xa7   :  { %v51_v12 = vmul.f32 1.442695, %v50_v11 }
  0xa8   :  { %v61_v13 = vpop.xlane.xlu0 %60 }
  0xa9   :  { %157 = vpow2.f32 %v51_v12  ;;  %v62_v15 = vsub.f32 %v45_v3, %v61_v13 }
  0xaa   :  { %159 = vpow2.f32 %v82_v14 }
  0xab   :  { %v63_v16 = vmul.f32 1.442695, %v62_v15 }
  0xad   :  { %161 = vpow2.f32 %v63_v16 }
  0xb3   :  { %v158_v17 = vpop.eup %157 }
  0xb4   :  { %v53_v18 = vsel %vm46_vm0, %v158_v17, 0.0  ;;  %v160_v19 = vpop.eup %159 }
  0xb5   :  { %54 = vadd.xlane.f32.xlu1 %v53_v18  ;;  %v84_v22 = vsel %vm46_vm0, %v160_v19, 0.0 }
  0xb7   :  { %v162_v20 = vpop.eup %161 }
  0xb8   :  { %v65_v21 = vsel %vm46_vm0, %v162_v20, 0.0 }
  0xb9   :  { %66 = vadd.xlane.f32.xlu0 %v65_v21 }
  0xbd   :  { %85 = vadd.xlane.f32.xlu0 %v84_v22 }
  0xc6   :  { %93 = vperm.xlu1 %155, %v32_v23  }
 0x142   :  { %v55_v25 = vpop.xlane.xlu1 %54 }
 0x143   :  { %163 = vlog2.f32 %v55_v25 }
 0x146   :  { %v94_v27 = vpop.permute.xlu1 %93  ;;  %v67_v28 = vpop.xlane.xlu0 %66 }
 0x147   :  { %vm95_vm1 = vcmp.eq.s32.totalorder %v91_v26, %v94_v27  ;;  %165 = vlog2.f32 %v67_v28 }
 0x148   :  { %v149_v30 = vsel %vm95_vm1, 1.0, %v245_v29  ;;  %167 = vrcp.f32 %v67_v28 }
 0x149   :  { %v98_v31 = vmul.f32 %v149_v30, %v30_v0 }
 0x14a   :  { %v86_v44 = vpop.xlane.xlu0 %85 }
 0x14b   :  { %v99_v32 = vsel %vm46_vm0, %v98_v31, 0.0  ;;  %169 = vlog2.f32 %v86_v44 }
 0x14c   :  { %100 = vadd.xlane.f32.xlu0 %v99_v32 }
 0x14d   :  { %v164_v33 = vpop.eup %163 }
 0x14e   :  { %v57_v34 = vmul.f32 0.6931472, %v164_v33 }
 0x150   :  { %v58_v38 = vsub.f32 %v50_v11, %v57_v34 }
 0x151   :  { %v166_v35 = vpop.eup %165 }
 0x152   :  { %v71_v36 = vmul.f32 0.6931472, %v166_v35  ;;  %v168_v37 = vpop.eup %167 }
 0x153   :  { %v69_v40 = vmul.f32 %v168_v37, %v162_v20 }
 0x154   :  { %v72_v39 = vsub.f32 %v62_v15, %v71_v36 }
 0x155   :  { %v170_v45 = vpop.eup %169 }
 0x156   :  { %v73_v41 = vsub.f32 %v72_v39, %v58_v38  ;;  %v88_v46 = vmul.f32 0.6931472, %v170_v45 }
 0x158   :  { %v74_v42 = vmul.f32 %v73_v41, %v69_v40  ;;  %v89_v47 = vadd.f32 %v88_v46, %v80_v8 }
 0x15a   :  { %v75_v43 = vsel %vm46_vm0, %v74_v42, 0.0 }
 0x15b   :  { %76 = vadd.xlane.f32.xlu0 %v75_v43 }
 0x1d9   :  { %v101_v48 = vpop.xlane.xlu0 %100 }
 0x1da   :  { %v102_v49 = vsub.f32 %v89_v47, %v101_v48 }
 0x1dc   :  { %v113_v50 = vrot.slane %v102_v49, 4 }
 0x1de   :  { %v114_v51 = vadd.f32 %v113_v50, %v102_v49 }
 0x1e0   :  { %v115_v52 = vrot.slane %v114_v51, 2 }
 0x1e2   :  { %v116_v53 = vadd.f32 %v115_v52, %v114_v51 }
 0x1e4   :  { %v117_v54 = vrot.slane %v116_v53, 1 }
 0x1e6   :  { %v118_v55 = vadd.f32 %v117_v54, %v116_v53 }
 0x1e8   :  { %119 = vst.msk [vmem:[#allocation6] sm:$0x1] %vm110_vm2, %v118_v55  ;;  %v77_v56 = vpop.xlane.xlu0 %76 }
 0x1e9   :  { %204 = shalt.err (!%p201_p12)
}
 0x1ea   :  { %s205_s8 = scalar_lea.hbm %s329_s4, 16 }
 0x1eb   :  { %p206_p13 = scmp.ne.s32.totalorder %s329_s4, %s205_s8  ;;  %p209_p0 = scmp.lt.u32.totalorder %s205_s8, %s329_s4 }
 0x1ed   :  { %p211_p1 = pnand %p209_p0, %p206_p13 }
 0x1ef   :  { %214 = shalt.err (!%p211_p1)
}
 0x1f0   :  { %139 = dma.vmem_to_hbm [thread:$0]  %s137_s29, 16, %s329_s4, [#allocation7]   ;;  %v104_v57 = vrot.slane %v77_v56, 4 }
 0x1f1   :  { %s247_s15 = smov [#allocation5]  }
 0x1f2   :  { %v105_v58 = vadd.f32 %v104_v57, %v77_v56  ;;  %s126_s16 = sshll.u32 %s247_s15, 4  ;;  %s127_s16 = int_to_ptr.vmem [resolvable:$true] %s126_s16 }
 0x1f3   :  { %s215_s17 = scalar_lea.vmem %s127_s16, 16  ;;  %s219_s18 = scalar_lea.vmem %s127_s16, 32 }
 0x1f4   :  { %v106_v59 = vrot.slane %v105_v58, 2  ;;  %p216_p2 = scmp.ne.s32.totalorder %s127_s16, %s215_s17  ;;  %p220_p3 = scmp.lt.s32.totalorder %s127_s16, %s127_s16 }
 0x1f5   :  { %p221_p4 = scmp.lt.s32.totalorder %s219_s18, %s215_s17 }
 0x1f6   :  { %v107_v60 = vadd.f32 %v106_v59, %v105_v58 }
 0x1f7   :  { %p222_p5 = por %p221_p4, %p220_p3 }
 0x1f8   :  { %v108_v61 = vrot.slane %v107_v60, 1 }
 0x1f9   :  { %p223_p6 = pnand %p222_p5, %p216_p2 }
 0x1fa   :  { %v109_v62 = vadd.f32 %v108_v61, %v107_v60 }
 0x1fc   :  { %111 = vst.msk [vmem:[#allocation5] sm:$0x1] %vm110_vm2, %v109_v62 }
 0x1fd   :  { %226 = shalt.err (!%p223_p6)
}
 0x1fe   :  { %s227_s20 = scalar_lea.hbm %s328_s3, 16 }
 0x1ff   :  { %p228_p7 = scmp.ne.s32.totalorder %s328_s3, %s227_s20  ;;  %p231_p8 = scmp.lt.u32.totalorder %s227_s20, %s328_s3 }
 0x201   :  { %p233_p9 = pnand %p231_p8, %p228_p7 }
 0x203   :  { %236 = shalt.err (!%p233_p9)
}
 0x204   :  { %129 = dma.vmem_to_hbm [thread:$0]  %s127_s16, 16, %s328_s3, [#allocation4]  }
 0x205   :  { %239 = dma.done.wait [#allocation4], 16  }
 0x206   :  { %240 = vsyncadd [#allocation4], 4294967280 }
 0x207   :  { %241 = dma.done.wait [#allocation7], 16  }
 0x208   :  { %242 = vsyncadd [#allocation7], 4294967280 }
 0x209   :  { %146 = vsyncpa [#allocation3], 1 }
 0x20a   :  { %147 = vsyncpa [#allocation4], 1 }
 0x20b   :  { %148 = vsyncpa [#allocation7], 1 }

</bundles_post_ra>
